<compile_context>
chip_gen: v7x
topology: tpu7x:2x2x1
jax: 0.10.0
libtpu: 0.0.40
codegen_flags: <defaults>
</compile_context>

<pallas_src>
import functools

import jax
import jax.numpy as jnp
from jax.experimental import pallas as pl
from jax.experimental.pallas import tpu as pltpu

SELU_ALPHA = 1.6732632423543772
SELU_SCALE = 1.0507009873554805
LANE = 128


def _round_up(n: int, m: int) -> int:
    return ((n + m - 1) // m) * m


def _min_sublane(dtype) -> int:
    # Minimum second-minor tile per dtype: f32 -> 8, bf16 -> 16, int8/fp8 -> 32.
    return {4: 8, 2: 16, 1: 32}.get(jnp.dtype(dtype).itemsize, 8)


def _selu(y):
    # torch.nn.SELU: scale * (x if x > 0 else alpha * (exp(x) - 1))
    neg = SELU_ALPHA * (jnp.exp(jnp.minimum(y, 0.0)) - 1.0)
    return SELU_SCALE * jnp.where(y > 0.0, y, neg)


def _const_index_map(rank: int):
    zeros = (0,) * rank
    return lambda i: zeros


def _fused_mlp_kernel(x_ref, *refs, n_hidden: int, has_output: bool):
    """Whole MLP on one (batch_tile, d_in_pad) tile; weights are VMEM-resident."""
    o_ref = refs[-1]
    p = refs[:-1]
    idx = 0
    w_first_ref = p[idx]; idx += 1
    w_hidden_ref = None
    if n_hidden > 1:
        w_hidden_ref = p[idx]; idx += 1
    b_hidden_ref = p[idx]; idx += 1
    if has_output:
        w_out_ref = p[idx]
        b_out_ref = p[idx + 1]

    # bf16 MXU operands, f32 accumulation.
    h = x_ref[...].astype(jnp.bfloat16)
    y = jnp.dot(h, w_first_ref[...], preferred_element_type=jnp.float32)
    h = _selu(y + b_hidden_ref[0:1, :])
    # TODO(synk): dropout implemented as inference-mode identity (eval semantics).
    for l in range(1, n_hidden):  # unrolled at trace time (n_hidden is static)
        y = jnp.dot(h.astype(jnp.bfloat16), w_hidden_ref[l - 1],
                    preferred_element_type=jnp.float32)
        h = _selu(y + b_hidden_ref[l:l + 1, :])
    if has_output:
        h = jnp.dot(h.astype(jnp.bfloat16), w_out_ref[...],
                    preferred_element_type=jnp.float32) + b_out_ref[...]
    o_ref[...] = h.astype(o_ref.dtype)


def prepare_mlp_params(params, compute_dtype=jnp.bfloat16):
    """Pad/cast/stack parameters ONCE (call at init, reuse across forwards)."""
    blocks = params["blocks"]
    output = params["output"]
    n_hidden = len(blocks)
    d_in = blocks[0][0].shape[0]
    d_block = blocks[0][0].shape[1]
    has_output = output is not None
    d_out = output[0].shape[1] if has_output else d_block

    d_in_p = _round_up(d_in, LANE)
    d_block_p = _round_up(d_block, LANE)
    d_out_p = _round_up(d_out, LANE)

    w0, _ = blocks[0]
    w_first = jnp.pad(w0, ((0, d_in_p - d_in),
                           (0, d_block_p - d_block))).astype(compute_dtype)
    b_hidden = jnp.stack(
        [jnp.pad(b, (0, d_block_p - d_block)) for (_, b) in blocks]
    ).astype(jnp.float32)                                   # (n_hidden, d_block_p)
    operands = [w_first]
    if n_hidden > 1:
        w_hidden = jnp.stack(
            [jnp.pad(w, ((0, d_block_p - d_block), (0, d_block_p - d_block)))
             for (w, _) in blocks[1:]]
        ).astype(compute_dtype)                              # (n_hidden-1, dbp, dbp)
        operands.append(w_hidden)
    operands.append(b_hidden)
    if has_output:
        w, b = output
        w_out = jnp.pad(w, ((0, d_block_p - d_block),
                            (0, d_out_p - d_out))).astype(compute_dtype)
        b_out = jnp.pad(b, (0, d_out_p - d_out)).astype(jnp.float32).reshape(1, d_out_p)
        operands += [w_out, b_out]

    return {
        "operands": tuple(operands),
        "n_hidden": n_hidden,
        "has_output": has_output,
        "d_in": d_in, "d_in_p": d_in_p,
        "d_block": d_block, "d_block_p": d_block_p,
        "d_out": d_out, "d_out_p": d_out_p,
    }


def _vmem_cap_bytes() -> int:
    try:
        return int(pltpu.get_tpu_info().vmem_capacity_bytes)
    except Exception:
        return 64 * 1024 * 1024  # conservative default (v7x per-TensorCore)


def mlp_forward(prepared, x, *, batch_tile: int | None = None):
    """x: (B, d_in) -> (B, d_out).  Single fused pallas_call over batch tiles."""
    B, d_in = x.shape
    assert d_in == prepared["d_in"], (d_in, prepared["d_in"])
    n_hidden = prepared["n_hidden"]
    has_output = prepared["has_output"]
    d_in_p = prepared["d_in_p"]
    d_block_p = prepared["d_block_p"]
    d_out = prepared["d_out"]
    d_out_p = prepared["d_out_p"]
    operands = prepared["operands"]
    out_dim = d_out_p if has_output else d_block_p

    # Batch tile: dtype-aware sublane rounding; big tiles for large B
    # (single-TC v5e/v6e streaming), >=2 tiles for mid B (v7x megacore).
    sub = _min_sublane(x.dtype)
    if batch_tile is None:
        if B >= 1024:
            batch_tile = 512
        elif B > 2 * sub:
            batch_tile = _round_up(-(-B // 2), sub)
        else:
            batch_tile = _round_up(max(B, sub), sub)
    else:
        batch_tile = _round_up(batch_tile, sub)
    B_p = _round_up(max(B, batch_tile), batch_tile)
    grid = B_p // batch_tile

    # Zero-padding preserves the math: SELU(0)=0 and zero weight rows/cols
    # contribute nothing; padded batch rows are sliced off at the end.
    x_p = jnp.pad(x, ((0, B_p - B), (0, d_in_p - d_in)))

    # Advisory cost estimate.
    flops = 2 * B_p * d_in_p * d_block_p
    flops += 2 * B_p * (n_hidden - 1) * d_block_p * d_block_p
    if has_output:
        flops += 2 * B_p * d_block_p * d_out_p
    transcendentals = B_p * d_block_p * n_hidden
    weight_bytes = sum(op.size * op.dtype.itemsize for op in operands)
    bytes_accessed = (x_p.size * x_p.dtype.itemsize + weight_bytes
                      + B_p * out_dim * x.dtype.itemsize)

    kernel = functools.partial(_fused_mlp_kernel,
                               n_hidden=n_hidden, has_output=has_output)

    # VMEM budget derived from actual sizes (not a hard-coded 32 MiB).
    in_tile_bytes = batch_tile * d_in_p * x.dtype.itemsize
    out_tile_bytes = batch_tile * out_dim * x.dtype.itemsize
    act_bytes = batch_tile * max(d_in_p, d_block_p, out_dim) * 4 * 4  # live temps
    hard_cap = int(0.8 * _vmem_cap_bytes())   # ~102 MiB v5e/v6e, ~51 MiB v7x

    def build_and_run(single_buffer_weights: bool):
        def wspec(shape):
            if single_buffer_weights:
                return pl.BlockSpec(shape, _const_index_map(len(shape)),
                                    pipeline_mode=pl.Buffered(1))
            return pl.BlockSpec(shape, _const_index_map(len(shape)))

        in_specs = [pl.BlockSpec((batch_tile, d_in_p), lambda i: (i, 0))]
        in_specs += [wspec(op.shape) for op in operands]

        wbuf = 1 if single_buffer_weights else 2
        needed = (wbuf * weight_bytes
                  + 2 * (in_tile_bytes + out_tile_bytes) + act_bytes)
        vmem_limit = int(min(max(int(needed * 1.3) + (2 << 20), 8 << 20), hard_cap))

        return pl.pallas_call(
            kernel,
            out_shape=jax.ShapeDtypeStruct((B_p, out_dim), x.dtype),
            grid_spec=pltpu.PrefetchScalarGridSpec(
                num_scalar_prefetch=0,
                grid=(grid,),
                in_specs=in_specs,
                out_specs=pl.BlockSpec((batch_tile, out_dim), lambda i: (i, 0)),
            ),
            compiler_params=pltpu.CompilerParams(
                dimension_semantics=("parallel",),
                vmem_limit_bytes=vmem_limit,
            ),
            cost_estimate=pl.CostEstimate(
                flops=int(flops),
                transcendentals=int(transcendentals),
                bytes_accessed=int(bytes_accessed)),
        )(x_p, *operands)

    try:
        out_p = build_and_run(True)
    except Exception:
        # pipeline_mode=Buffered(1) unsupported on this jax version -> fall back
        # to default (double-buffered) resident weights.
        out_p = build_and_run(False)

    return out_p[:B, :d_out]


def init_mlp_params(key, *, d_in, d_out, n_blocks, d_block, dtype=jnp.float32):
    """Deterministic init mirroring torch.nn.Linear default (uniform +-1/sqrt(fan_in))."""
    params = {"blocks": [], "output": None}
    for i in range(n_blocks):
        fan_in = d_in if i == 0 else d_block
        key, kw, kb = jax.random.split(key, 3)
        bound = 1.0 / (fan_in ** 0.5)
        w = jax.random.uniform(kw, (fan_in, d_block), dtype, -bound, bound)
        b = jax.random.uniform(kb, (d_block,), dtype, -bound, bound)
        params["blocks"].append((w, b))
    if d_out is not None:
        key, kw, kb = jax.random.split(key, 3)
        bound = 1.0 / (d_block ** 0.5)
        w = jax.random.uniform(kw, (d_block, d_out), dtype, -bound, bound)
        b = jax.random.uniform(kb, (d_out,), dtype, -bound, bound)
        params["output"] = (w, b)
    return params


def mlp_reference(params, x, compute_dtype=jnp.float32):
    """Pure-JAX reference; compute_dtype controls the matmul operand precision."""
    h = x.astype(jnp.float32)
    for (w, b) in params["blocks"]:
        y = jnp.dot(h.astype(compute_dtype), w.astype(compute_dtype),
                    preferred_element_type=jnp.float32) + b
        h = _selu(y)
    if params["output"] is not None:
        w, b = params["output"]
        h = jnp.dot(h.astype(compute_dtype), w.astype(compute_dtype),
                    preferred_element_type=jnp.float32) + b
    return h


if __name__ == "__main__":
    key = jax.random.PRNGKey(0)
    k_x, k_p, k_x2 = jax.random.split(key, 3)

    batch, d_in, d_block, d_out, n_blocks = 8, 32, 128, 16, 2
    x = jax.random.normal(k_x, (batch, d_in), jnp.float32)
    params = init_mlp_params(k_p, d_in=d_in, d_out=d_out,
                             n_blocks=n_blocks, d_block=d_block)
    prepared = prepare_mlp_params(params)   # pad + bf16 cast + stack ONCE

    out = jax.block_until_ready(mlp_forward(prepared, x))
    ref_bf16 = mlp_reference(params, x, compute_dtype=jnp.bfloat16)
    ref_f32 = mlp_reference(params, x)
    assert out.shape == (batch, d_out), out.shape
    assert jnp.allclose(out, ref_bf16, atol=2e-2, rtol=2e-2), "mismatch vs bf16 reference"
    assert jnp.allclose(out, ref_f32, atol=2.5e-1, rtol=2.5e-1), "mismatch vs f32 reference"

    # Second check: non-tile-multiple batch + multi-step grid (padding path).
    x2 = jax.random.normal(k_x2, (200, d_in), jnp.float32)
    out2 = jax.block_until_ready(mlp_forward(prepared, x2, batch_tile=128))
    ref2 = mlp_reference(params, x2, compute_dtype=jnp.bfloat16)
    assert out2.shape == (200, d_out), out2.shape
    assert jnp.allclose(out2, ref2, atol=2e-2, rtol=2e-2), "mismatch vs reference (padded)"

    print("KERNEL_OK")
</pallas_src>

<mosaic_0001>
module attributes {stable_mosaic.version = 11 : i64} {
  func.func @_fused_mlp_kernel(%arg0: i32, %arg1: memref<8x128xf32, #tpu.memory_space<vmem>>, %arg2: memref<128x128xbf16, #tpu.memory_space<vmem>>, %arg3: memref<1x128x128xbf16, #tpu.memory_space<vmem>>, %arg4: memref<2x128xf32, #tpu.memory_space<vmem>>, %arg5: memref<128x128xbf16, #tpu.memory_space<vmem>>, %arg6: memref<1x128xf32, #tpu.memory_space<vmem>>, %arg7: memref<8x128xf32, #tpu.memory_space<vmem>>) attributes {dimension_semantics = [#tpu.dimension_semantics<parallel>], iteration_bounds = array<i64: 1>, scalar_prefetch = 0 : i64, scratch_operands = 0 : i64, tpu.core_type = #tpu.core_type<tc>, window_params = [{transform_indices = @transform_0, window_bounds = array<i64: 8, 128>}, {pipeline_mode = #tpu.pipeline_mode<synchronous>, transform_indices = @transform_1, window_bounds = array<i64: 128, 128>}, {pipeline_mode = #tpu.pipeline_mode<synchronous>, transform_indices = @transform_2, window_bounds = array<i64: 1, 128, 128>}, {pipeline_mode = #tpu.pipeline_mode<synchronous>, transform_indices = @transform_3, window_bounds = array<i64: 2, 128>}, {pipeline_mode = #tpu.pipeline_mode<synchronous>, transform_indices = @transform_4, window_bounds = array<i64: 128, 128>}, {pipeline_mode = #tpu.pipeline_mode<synchronous>, transform_indices = @transform_5, window_bounds = array<i64: 1, 128>}, {transform_indices = @transform_6, window_bounds = array<i64: 8, 128>}]} {
    %c0 = arith.constant 0 : index
    %c0_0 = arith.constant 0 : index
    %0 = vector.load %arg1[%c0, %c0_0] : memref<8x128xf32, #tpu.memory_space<vmem>>, vector<8x128xf32>
    %1 = arith.truncf %0 : vector<8x128xf32> to vector<8x128xbf16>
    %c0_1 = arith.constant 0 : index
    %c0_2 = arith.constant 0 : index
    %2 = vector.load %arg2[%c0_1, %c0_2] : memref<128x128xbf16, #tpu.memory_space<vmem>>, vector<128x128xbf16>
    %cst = arith.constant dense<0.000000e+00> : vector<8x128xf32>
    %3 = tpu.matmul %1, %2, %cst {dimension_numbers = #tpu.dot_dimension_numbers<[1], [0], [0], [1], [0, 0, 1, 1], [], []>} : vector<8x128xbf16>, vector<128x128xbf16>, vector<8x128xf32> -> vector<8x128xf32>
    %c0_3 = arith.constant 0 : index
    %c0_4 = arith.constant 0 : index
    %4 = vector.load %arg4[%c0_3, %c0_4] : memref<2x128xf32, #tpu.memory_space<vmem>>, vector<1x128xf32>
    %5 = vector.broadcast %4 : vector<1x128xf32> to vector<8x128xf32>
    %6 = arith.addf %3, %5 : vector<8x128xf32>
    %cst_5 = arith.constant 0.000000e+00 : f32
    %7 = vector.broadcast %cst_5 : f32 to vector<8x128xf32>
    %8 = arith.minimumf %6, %7 : vector<8x128xf32>
    %9 = math.exp %8 : vector<8x128xf32>
    %cst_6 = arith.constant 1.000000e+00 : f32
    %10 = vector.broadcast %cst_6 : f32 to vector<8x128xf32>
    %11 = arith.subf %9, %10 : vector<8x128xf32>
    %cst_7 = arith.constant 1.67326319 : f32
    %12 = vector.broadcast %cst_7 : f32 to vector<8x128xf32>
    %13 = arith.mulf %12, %11 : vector<8x128xf32>
    %cst_8 = arith.constant 0.000000e+00 : f32
    %14 = vector.broadcast %cst_8 : f32 to vector<8x128xf32>
    %15 = arith.cmpf ogt, %6, %14 : vector<8x128xf32>
    %16 = arith.select %15, %6, %13 : vector<8x128xi1>, vector<8x128xf32>
    %cst_9 = arith.constant 1.05070102 : f32
    %17 = vector.broadcast %cst_9 : f32 to vector<8x128xf32>
    %18 = arith.mulf %17, %16 : vector<8x128xf32>
    %19 = arith.truncf %18 : vector<8x128xf32> to vector<8x128xbf16>
    %c0_10 = arith.constant 0 : index
    %c0_11 = arith.constant 0 : index
    %c0_12 = arith.constant 0 : index
    %20 = vector.load %arg3[%c0_10, %c0_11, %c0_12] : memref<1x128x128xbf16, #tpu.memory_space<vmem>>, vector<1x128x128xbf16>
    %21 = vector.shape_cast %20 : vector<1x128x128xbf16> to vector<128x128xbf16>
    %cst_13 = arith.constant dense<0.000000e+00> : vector<8x128xf32>
    %22 = tpu.matmul %19, %21, %cst_13 {dimension_numbers = #tpu.dot_dimension_numbers<[1], [0], [0], [1], [0, 0, 1, 1], [], []>} : vector<8x128xbf16>, vector<128x128xbf16>, vector<8x128xf32> -> vector<8x128xf32>
    %c1 = arith.constant 1 : index
    %c0_14 = arith.constant 0 : index
    %23 = vector.load %arg4[%c1, %c0_14] : memref<2x128xf32, #tpu.memory_space<vmem>>, vector<1x128xf32>
    %24 = vector.broadcast %23 : vector<1x128xf32> to vector<8x128xf32>
    %25 = arith.addf %22, %24 : vector<8x128xf32>
    %cst_15 = arith.constant 0.000000e+00 : f32
    %26 = vector.broadcast %cst_15 : f32 to vector<8x128xf32>
    %27 = arith.minimumf %25, %26 : vector<8x128xf32>
    %28 = math.exp %27 : vector<8x128xf32>
    %cst_16 = arith.constant 1.000000e+00 : f32
    %29 = vector.broadcast %cst_16 : f32 to vector<8x128xf32>
    %30 = arith.subf %28, %29 : vector<8x128xf32>
    %cst_17 = arith.constant 1.67326319 : f32
    %31 = vector.broadcast %cst_17 : f32 to vector<8x128xf32>
    %32 = arith.mulf %31, %30 : vector<8x128xf32>
    %cst_18 = arith.constant 0.000000e+00 : f32
    %33 = vector.broadcast %cst_18 : f32 to vector<8x128xf32>
    %34 = arith.cmpf ogt, %25, %33 : vector<8x128xf32>
    %35 = arith.select %34, %25, %32 : vector<8x128xi1>, vector<8x128xf32>
    %cst_19 = arith.constant 1.05070102 : f32
    %36 = vector.broadcast %cst_19 : f32 to vector<8x128xf32>
    %37 = arith.mulf %36, %35 : vector<8x128xf32>
    %38 = arith.truncf %37 : vector<8x128xf32> to vector<8x128xbf16>
    %c0_20 = arith.constant 0 : index
    %c0_21 = arith.constant 0 : index
    %39 = vector.load %arg5[%c0_20, %c0_21] : memref<128x128xbf16, #tpu.memory_space<vmem>>, vector<128x128xbf16>
    %cst_22 = arith.constant dense<0.000000e+00> : vector<8x128xf32>
    %40 = tpu.matmul %38, %39, %cst_22 {dimension_numbers = #tpu.dot_dimension_numbers<[1], [0], [0], [1], [0, 0, 1, 1], [], []>} : vector<8x128xbf16>, vector<128x128xbf16>, vector<8x128xf32> -> vector<8x128xf32>
    %c0_23 = arith.constant 0 : index
    %c0_24 = arith.constant 0 : index
    %41 = vector.load %arg6[%c0_23, %c0_24] : memref<1x128xf32, #tpu.memory_space<vmem>>, vector<1x128xf32>
    %42 = vector.broadcast %41 : vector<1x128xf32> to vector<8x128xf32>
    %43 = arith.addf %40, %42 : vector<8x128xf32>
    %c0_25 = arith.constant 0 : index
    %c0_26 = arith.constant 0 : index
    %44 = vector.load %arg7[%c0_25, %c0_26] : memref<8x128xf32, #tpu.memory_space<vmem>>, vector<8x128xf32>
    tpu.vector_store %arg7[%c0_25, %c0_26], %43 {strides = array<i32>} : memref<8x128xf32, #tpu.memory_space<vmem>>, vector<8x128xf32>,
    return
  }
  func.func @transform_0(%arg0: i32) -> (i32, i32) {
    %c0_i32 = arith.constant 0 : i32
    %c0_i32_0 = arith.constant 0 : i32
    return %arg0, %c0_i32 : i32, i32
  }
  func.func @transform_1(%arg0: i32) -> (i32, i32) {
    %c0_i32 = arith.constant 0 : i32
    %c0_i32_0 = arith.constant 0 : i32
    %c0_i32_1 = arith.constant 0 : i32
    return %c0_i32, %c0_i32_0 : i32, i32
  }
  func.func @transform_2(%arg0: i32) -> (i32, i32, i32) {
    %c0_i32 = arith.constant 0 : i32
    %c0_i32_0 = arith.constant 0 : i32
    %c0_i32_1 = arith.constant 0 : i32
    %c0_i32_2 = arith.constant 0 : i32
    return %c0_i32, %c0_i32_0, %c0_i32_1 : i32, i32, i32
  }
  func.func @transform_3(%arg0: i32) -> (i32, i32) {
    %c0_i32 = arith.constant 0 : i32
    %c0_i32_0 = arith.constant 0 : i32
    %c0_i32_1 = arith.constant 0 : i32
    return %c0_i32, %c0_i32_0 : i32, i32
  }
  func.func @transform_4(%arg0: i32) -> (i32, i32) {
    %c0_i32 = arith.constant 0 : i32
    %c0_i32_0 = arith.constant 0 : i32
    %c0_i32_1 = arith.constant 0 : i32
    return %c0_i32, %c0_i32_0 : i32, i32
  }
  func.func @transform_5(%arg0: i32) -> (i32, i32) {
    %c0_i32 = arith.constant 0 : i32
    %c0_i32_0 = arith.constant 0 : i32
    %c0_i32_1 = arith.constant 0 : i32
    return %c0_i32, %c0_i32_0 : i32, i32
  }
  func.func @transform_6(%arg0: i32) -> (i32, i32) {
    %c0_i32 = arith.constant 0 : i32
    %c0_i32_0 = arith.constant 0 : i32
    return %arg0, %c0_i32 : i32, i32
  }
}

module attributes {stable_mosaic.version = 11 : i64} {
  func.func @_fused_mlp_kernel(%arg0: i32, %arg1: memref<8x128xf32, #tpu.memory_space<vmem>>, %arg2: memref<128x128xbf16, #tpu.memory_space<vmem>>, %arg3: memref<1x128x128xbf16, #tpu.memory_space<vmem>>, %arg4: memref<2x128xf32, #tpu.memory_space<vmem>>, %arg5: memref<128x128xbf16, #tpu.memory_space<vmem>>, %arg6: memref<1x128xf32, #tpu.memory_space<vmem>>, %arg7: memref<8x128xf32, #tpu.memory_space<vmem>>) attributes {dimension_semantics = [#tpu.dimension_semantics<parallel>], iteration_bounds = array<i64: 1>, scalar_prefetch = 0 : i64, scratch_operands = 0 : i64, tpu.core_type = #tpu.core_type<tc>, window_params = [{transform_indices = @transform_0, window_bounds = array<i64: 8, 128>}, {pipeline_mode = #tpu.pipeline_mode<synchronous>, transform_indices = @transform_1, window_bounds = array<i64: 128, 128>}, {pipeline_mode = #tpu.pipeline_mode<synchronous>, transform_indices = @transform_2, window_bounds = array<i64: 1, 128, 128>}, {pipeline_mode = #tpu.pipeline_mode<synchronous>, transform_indices = @transform_3, window_bounds = array<i64: 2, 128>}, {pipeline_mode = #tpu.pipeline_mode<synchronous>, transform_indices = @transform_4, window_bounds = array<i64: 128, 128>}, {pipeline_mode = #tpu.pipeline_mode<synchronous>, transform_indices = @transform_5, window_bounds = array<i64: 1, 128>}, {transform_indices = @transform_6, window_bounds = array<i64: 8, 128>}]} {
    %c0 = arith.constant 0 : index
    %c0_0 = arith.constant 0 : index
    %0 = vector.load %arg1[%c0, %c0_0] : memref<8x128xf32, #tpu.memory_space<vmem>>, vector<8x128xf32>
    %1 = arith.truncf %0 : vector<8x128xf32> to vector<8x128xbf16>
    %c0_1 = arith.constant 0 : index
    %c0_2 = arith.constant 0 : index
    %2 = vector.load %arg2[%c0_1, %c0_2] : memref<128x128xbf16, #tpu.memory_space<vmem>>, vector<128x128xbf16>
    %cst = arith.constant dense<0.000000e+00> : vector<8x128xf32>
    %3 = tpu.matmul %1, %2, %cst {dimension_numbers = #tpu.dot_dimension_numbers<[1], [0], [0], [1], [0, 0, 1, 1], [], []>} : vector<8x128xbf16>, vector<128x128xbf16>, vector<8x128xf32> -> vector<8x128xf32>
    %c0_3 = arith.constant 0 : index
    %c0_4 = arith.constant 0 : index
    %4 = vector.load %arg4[%c0_3, %c0_4] : memref<2x128xf32, #tpu.memory_space<vmem>>, vector<1x128xf32>
    %5 = vector.broadcast %4 : vector<1x128xf32> to vector<8x128xf32>
    %6 = arith.addf %3, %5 : vector<8x128xf32>
    %cst_5 = arith.constant 0.000000e+00 : f32
    %7 = vector.broadcast %cst_5 : f32 to vector<8x128xf32>
    %8 = arith.minimumf %6, %7 : vector<8x128xf32>
    %9 = math.exp %8 : vector<8x128xf32>
    %cst_6 = arith.constant 1.000000e+00 : f32
    %10 = vector.broadcast %cst_6 : f32 to vector<8x128xf32>
    %11 = arith.subf %9, %10 : vector<8x128xf32>
    %cst_7 = arith.constant 1.67326319 : f32
    %12 = vector.broadcast %cst_7 : f32 to vector<8x128xf32>
    %13 = arith.mulf %12, %11 : vector<8x128xf32>
    %cst_8 = arith.constant 0.000000e+00 : f32
    %14 = vector.broadcast %cst_8 : f32 to vector<8x128xf32>
    %15 = arith.cmpf ogt, %6, %14 : vector<8x128xf32>
    %16 = arith.select %15, %6, %13 : vector<8x128xi1>, vector<8x128xf32>
    %cst_9 = arith.constant 1.05070102 : f32
    %17 = vector.broadcast %cst_9 : f32 to vector<8x128xf32>
    %18 = arith.mulf %17, %16 : vector<8x128xf32>
    %19 = arith.truncf %18 : vector<8x128xf32> to vector<8x128xbf16>
    %c0_10 = arith.constant 0 : index
    %c0_11 = arith.constant 0 : index
    %c0_12 = arith.constant 0 : index
    %20 = vector.load %arg3[%c0_10, %c0_11, %c0_12] : memref<1x128x128xbf16, #tpu.memory_space<vmem>>, vector<1x128x128xbf16>
    %21 = vector.shape_cast %20 : vector<1x128x128xbf16> to vector<128x128xbf16>
    %cst_13 = arith.constant dense<0.000000e+00> : vector<8x128xf32>
    %22 = tpu.matmul %19, %21, %cst_13 {dimension_numbers = #tpu.dot_dimension_numbers<[1], [0], [0], [1], [0, 0, 1, 1], [], []>} : vector<8x128xbf16>, vector<128x128xbf16>, vector<8x128xf32> -> vector<8x128xf32>
    %c1 = arith.constant 1 : index
    %c0_14 = arith.constant 0 : index
    %23 = vector.load %arg4[%c1, %c0_14] : memref<2x128xf32, #tpu.memory_space<vmem>>, vector<1x128xf32>
    %24 = vector.broadcast %23 : vector<1x128xf32> to vector<8x128xf32>
    %25 = arith.addf %22, %24 : vector<8x128xf32>
    %cst_15 = arith.constant 0.000000e+00 : f32
    %26 = vector.broadcast %cst_15 : f32 to vector<8x128xf32>
    %27 = arith.minimumf %25, %26 : vector<8x128xf32>
    %28 = math.exp %27 : vector<8x128xf32>
    %cst_16 = arith.constant 1.000000e+00 : f32
    %29 = vector.broadcast %cst_16 : f32 to vector<8x128xf32>
    %30 = arith.subf %28, %29 : vector<8x128xf32>
    %cst_17 = arith.constant 1.67326319 : f32
    %31 = vector.broadcast %cst_17 : f32 to vector<8x128xf32>
    %32 = arith.mulf %31, %30 : vector<8x128xf32>
    %cst_18 = arith.constant 0.000000e+00 : f32
    %33 = vector.broadcast %cst_18 : f32 to vector<8x128xf32>
    %34 = arith.cmpf ogt, %25, %33 : vector<8x128xf32>
    %35 = arith.select %34, %25, %32 : vector<8x128xi1>, vector<8x128xf32>
    %cst_19 = arith.constant 1.05070102 : f32
    %36 = vector.broadcast %cst_19 : f32 to vector<8x128xf32>
    %37 = arith.mulf %36, %35 : vector<8x128xf32>
    %38 = arith.truncf %37 : vector<8x128xf32> to vector<8x128xbf16>
    %c0_20 = arith.constant 0 : index
    %c0_21 = arith.constant 0 : index
    %39 = vector.load %arg5[%c0_20, %c0_21] : memref<128x128xbf16, #tpu.memory_space<vmem>>, vector<128x128xbf16>
    %cst_22 = arith.constant dense<0.000000e+00> : vector<8x128xf32>
    %40 = tpu.matmul %38, %39, %cst_22 {dimension_numbers = #tpu.dot_dimension_numbers<[1], [0], [0], [1], [0, 0, 1, 1], [], []>} : vector<8x128xbf16>, vector<128x128xbf16>, vector<8x128xf32> -> vector<8x128xf32>
    %c0_23 = arith.constant 0 : index
    %c0_24 = arith.constant 0 : index
    %41 = vector.load %arg6[%c0_23, %c0_24] : memref<1x128xf32, #tpu.memory_space<vmem>>, vector<1x128xf32>
    %42 = vector.broadcast %41 : vector<1x128xf32> to vector<8x128xf32>
    %43 = arith.addf %40, %42 : vector<8x128xf32>
    %c0_25 = arith.constant 0 : index
    %c0_26 = arith.constant 0 : index
    %44 = vector.load %arg7[%c0_25, %c0_26] : memref<8x128xf32, #tpu.memory_space<vmem>>, vector<8x128xf32>
    tpu.vector_store %arg7[%c0_25, %c0_26], %43 {strides = array<i32>} : memref<8x128xf32, #tpu.memory_space<vmem>>, vector<8x128xf32>,
    return
  }
  func.func @transform_0(%arg0: i32) -> (i32, i32) {
    %c0_i32 = arith.constant 0 : i32
    %c0_i32_0 = arith.constant 0 : i32
    return %arg0, %c0_i32 : i32, i32
  }
  func.func @transform_1(%arg0: i32) -> (i32, i32) {
    %c0_i32 = arith.constant 0 : i32
    %c0_i32_0 = arith.constant 0 : i32
    %c0_i32_1 = arith.constant 0 : i32
    return %c0_i32, %c0_i32_0 : i32, i32
  }
  func.func @transform_2(%arg0: i32) -> (i32, i32, i32) {
    %c0_i32 = arith.constant 0 : i32
    %c0_i32_0 = arith.constant 0 : i32
    %c0_i32_1 = arith.constant 0 : i32
    %c0_i32_2 = arith.constant 0 : i32
    return %c0_i32, %c0_i32_0, %c0_i32_1 : i32, i32, i32
  }
  func.func @transform_3(%arg0: i32) -> (i32, i32) {
    %c0_i32 = arith.constant 0 : i32
    %c0_i32_0 = arith.constant 0 : i32
    %c0_i32_1 = arith.constant 0 : i32
    return %c0_i32, %c0_i32_0 : i32, i32
  }
  func.func @transform_4(%arg0: i32) -> (i32, i32) {
    %c0_i32 = arith.constant 0 : i32
    %c0_i32_0 = arith.constant 0 : i32
    %c0_i32_1 = arith.constant 0 : i32
    return %c0_i32, %c0_i32_0 : i32, i32
  }
  func.func @transform_5(%arg0: i32) -> (i32, i32) {
    %c0_i32 = arith.constant 0 : i32
    %c0_i32_0 = arith.constant 0 : i32
    %c0_i32_1 = arith.constant 0 : i32
    return %c0_i32, %c0_i32_0 : i32, i32
  }
  func.func @transform_6(%arg0: i32) -> (i32, i32) {
    %c0_i32 = arith.constant 0 : i32
    %c0_i32_0 = arith.constant 0 : i32
    return %arg0, %c0_i32 : i32, i32
  }
}

</mosaic_0001>

<bundles_post_ra>
// kernel: tpu_custom_call.1
= control target key start
LH: loop header
LB: loop body
LE: loop exit
PB: predicated region body
PF: predicated region fallthrough
CT: control target
= control target key end

     0   :  { %11 = vsyncpa [#allocation3], 0  ;;  %s868_s0 = inlined_call_operand.hbm [shape: f32[8,128], index: 0, kind: input, shape index: {}]   ;;  %s869_s1 = inlined_call_operand.hbm [shape: bf16[128,128], index: 1, kind: input, shape index: {}]   ;;  %s870_s2 = inlined_call_operand.hbm [shape: bf16[1,128,128], index: 2, kind: input, shape index: {}]   ;;  %s871_s3 = inlined_call_operand.vmem [shape: f32[2,128], index: 3, kind: input, shape index: {}]   ;;  %s872_s4 = inlined_call_operand.hbm [shape: bf16[128,128], index: 4, kind: input, shape index: {}]   ;;  %s873_s5 = inlined_call_operand.vmem [shape: f32[1,128], index: 5, kind: input, shape index: {}]   ;;  %s874_s6 = inlined_call_operand.hbm [shape: f32[8,128], index: 6, kind: output, shape index: {}]  }
   0x1   :  { %12 = vsyncpa [#allocation6], 0 }
   0x2   :  { %13 = vsyncpa [#allocation9], 0 }
   0x3   :  { %14 = vsyncpa [#allocation4], 0  ;;  %s716_s21 = smov [#allocation5]   ;;  %s598_s25 = scalar_lea.hbm %s869_s1, 1024 }
   0x4   :  { %s30_s22 = sshll.u32 %s716_s21, 4  ;;  %p599_p0 = scmp.ne.s32.totalorder %s869_s1, %s598_s25  ;;  %s31_s22 = int_to_ptr.vmem [resolvable:$true] %s30_s22 }
   0x5   :  { %p602_p1 = scmp.lt.u32.totalorder %s598_s25, %s869_s1 }
   0x7   :  { %p604_p2 = pnand %p602_p1, %p599_p0 }
   0x9   :  { %607 = shalt.err (!%p604_p2)
}
   0xa   :  { %s608_s30 = scalar_lea.vmem %s31_s22, 1024  ;;  %p613_p4 = scmp.lt.s32.totalorder %s31_s22, %s31_s22 }
   0xb   :  { %p609_p3 = scmp.ne.s32.totalorder %s31_s22, %s608_s30  ;;  %p614_p5 = scmp.lt.s32.totalorder %s608_s30, %s608_s30 }
   0xd   :  { %p615_p6 = por %p614_p5, %p613_p4 }
   0xf   :  { %p616_p7 = pnand %p615_p6, %p609_p3 }
  0x11   :  { %619 = shalt.err (!%p616_p7)
}
  0x12   :  { %s717_s7 = smov 64   ;;  %s718_s8 = smov 4  }
  0x13   :  { %36 = dma.hbm_to_vmem [thread:$0]  %s869_s1, 1024, %s31_s22, [#allocation6], %s717_s7, %s717_s7, %s718_s8  }
  0x14   :  { %s719_s11 = smov [#allocation2]   ;;  %s720_s13 = smov [#allocation7]  }
  0x15   :  { %s21_s12 = sshll.u32 %s719_s11, 4  ;;  %s42_s14 = sshll.u32 %s720_s13, 4  ;;  %s22_s12 = int_to_ptr.vmem [resolvable:$true] %s21_s12  ;;  %s43_s14 = int_to_ptr.vmem [resolvable:$true] %s42_s14 }
  0x16   :  { %s620_s17 = scalar_lea.hbm %s868_s0, 128 }
  0x17   :  { %p621_p8 = scmp.ne.s32.totalorder %s868_s0, %s620_s17  ;;  %p624_p9 = scmp.lt.u32.totalorder %s620_s17, %s868_s0 }
  0x19   :  { %p626_p10 = pnand %p624_p9, %p621_p8 }
  0x1b   :  { %629 = shalt.err (!%p626_p10)
}
  0x1c   :  { %s630_s1 = scalar_lea.vmem %s22_s12, 128  ;;  %p635_p12 = scmp.lt.s32.totalorder %s22_s12, %s22_s12 }
  0x1d   :  { %p631_p11 = scmp.ne.s32.totalorder %s22_s12, %s630_s1  ;;  %p636_p13 = scmp.lt.s32.totalorder %s630_s1, %s630_s1 }
  0x1f   :  { %p637_p0 = por %p636_p13, %p635_p12 }
  0x21   :  { %p638_p1 = pnand %p637_p0, %p631_p11 }
  0x23   :  { %641 = shalt.err (!%p638_p1)
}
  0x24   :  { %24 = dma.hbm_to_vmem [thread:$0]  %s868_s0, 128, %s22_s12, [#allocation3]  }
  0x25   :  { %s642_s26 = scalar_lea.hbm %s870_s2, 1024 }
  0x26   :  { %p643_p2 = scmp.ne.s32.totalorder %s870_s2, %s642_s26  ;;  %p646_p3 = scmp.lt.u32.totalorder %s642_s26, %s870_s2 }
  0x28   :  { %p648_p4 = pnand %p646_p3, %p643_p2 }
  0x2a   :  { %651 = shalt.err (!%p648_p4)
}
  0x2b   :  { %s652_s9 = scalar_lea.vmem %s43_s14, 1024  ;;  %p657_p6 = scmp.lt.s32.totalorder %s43_s14, %s43_s14 }
  0x2c   :  { %p653_p5 = scmp.ne.s32.totalorder %s43_s14, %s652_s9  ;;  %p658_p7 = scmp.lt.s32.totalorder %s652_s9, %s652_s9 }
  0x2e   :  { %p659_p8 = por %p658_p7, %p657_p6 }
  0x30   :  { %p660_p9 = pnand %p659_p8, %p653_p5 }
  0x32   :  { %663 = shalt.err (!%p660_p9)
}
  0x33   :  { %48 = dma.hbm_to_vmem [thread:$0]  %s870_s2, 1024, %s43_s14, [#allocation6], %s717_s7, %s717_s7, %s718_s8  }
  0x34   :  { %s721_s11 = smov [#allocation8]   ;;  %s664_s16 = scalar_lea.hbm %s872_s4, 1024 }
  0x35   :  { %s56_s12 = sshll.u32 %s721_s11, 4  ;;  %p665_p10 = scmp.ne.s32.totalorder %s872_s4, %s664_s16  ;;  %s57_s12 = int_to_ptr.vmem [resolvable:$true] %s56_s12 }
  0x36   :  { %p668_p11 = scmp.lt.u32.totalorder %s664_s16, %s872_s4 }
  0x38   :  { %p670_p12 = pnand %p668_p11, %p665_p10 }
  0x3a   :  { %673 = shalt.err (!%p670_p12)
}
  0x3b   :  { %s674_s21 = scalar_lea.vmem %s57_s12, 1024  ;;  %p679_p0 = scmp.lt.s32.totalorder %s57_s12, %s57_s12 }
  0x3c   :  { %p675_p13 = scmp.ne.s32.totalorder %s57_s12, %s674_s21  ;;  %p680_p1 = scmp.lt.s32.totalorder %s674_s21, %s674_s21 }
  0x3e   :  { %p681_p2 = por %p680_p1, %p679_p0 }
  0x40   :  { %p682_p3 = pnand %p681_p2, %p675_p13 }
  0x42   :  { %685 = shalt.err (!%p682_p3)
}
  0x43   :  { %62 = dma.hbm_to_vmem [thread:$0]  %s872_s4, 1024, %s57_s12, [#allocation9], %s717_s7, %s717_s7, %s718_s8  }
  0x44   :  { %708 = dma.done.wait [#allocation3], 128  }
  0x45   :  { %709 = vsyncadd [#allocation3], 4294967168 }
  0x46   :  { %710 = dma.done.wait [#allocation6], 2048  }
  0x47   :  { %711 = vsyncadd [#allocation6], 4294965248 }
  0x48   :  { %712 = dma.done.wait [#allocation9], 1024  }
  0x49   :  { %713 = vsyncadd [#allocation9], 4294966272  ;;  %v722_v0 = vmov 0.0   ;;  %vm723_vm0 = vmmov 0   ;;  %v570_v1 = vld [vmem:[#allocation5] sm:$0xff]   ;;  %v571_v2 = vld [vmem:[#allocation5 + $0x8] sm:$0xff]  }
  0x4a   :  { %501 = vmatprep.subr.bf16.mxu0 %v722_v0  ;;  %517 = vmatprep.mubr.msk.bf16.mxu0 %vm723_vm0, %v722_v0  ;;  %v572_v3 = vld [vmem:[#allocation5 + $0x10] sm:$0xff]   ;;  %v573_v4 = vld [vmem:[#allocation5 + $0x18] sm:$0xff]   ;;  %v578_v5 = vld [vmem:[#allocation7] sm:$0xff]  }
  0x4b   :  { %521 = vmatprep.subr.bf16.mxu1 %v722_v0  ;;  %537 = vmatprep.mubr.msk.bf16.mxu1 %vm723_vm0, %v722_v0  ;;  %v574_v6 = vld [vmem:[#allocation5 + $0x20] sm:$0xff]   ;;  %v575_v7 = vld [vmem:[#allocation5 + $0x28] sm:$0xff]   ;;  %v576_v8 = vld [vmem:[#allocation5 + $0x30] sm:$0xff]  }
  0x4c   :  { %502 = vmatpush3.bf16.msra.mxu0 %v570_v1  ;;  %522 = vmatpush3.bf16.msra.mxu1 %v578_v5  ;;  %v577_v9 = vld [vmem:[#allocation5 + $0x38] sm:$0xff]   ;;  %v579_v12 = vld [vmem:[#allocation7 + $0x8] sm:$0xff]   ;;  %v580_v13 = vld [vmem:[#allocation7 + $0x10] sm:$0xff]  }
  0x4d   :  { %503 = vmatprep.subr.bf16.mxu0 %v722_v0  ;;  %523 = vmatprep.subr.bf16.mxu1 %v722_v0  ;;  %v78_v10 = vld [vmem:[#allocation2] sm:$0xff]  ;;  %v582_v15 = vld [vmem:[#allocation7 + $0x20] sm:$0xff]   ;;  %v583_v16 = vld [vmem:[#allocation7 + $0x28] sm:$0xff]  }
  0x4e   :  { %v79_v11 = vpack.c.bf16 %v78_v10, %v78_v10  ;;  %v581_v14 = vld [vmem:[#allocation7 + $0x18] sm:$0xff]   ;;  %v584_v17 = vld [vmem:[#allocation7 + $0x30] sm:$0xff]   ;;  %v586_v19 = vld [vmem:[#allocation8] sm:$0xff]  }
  0x4f   :  { %v585_v18 = vld [vmem:[#allocation7 + $0x38] sm:$0xff]   ;;  %v587_v34 = vld [vmem:[#allocation8 + $0x8] sm:$0xff]   ;;  %v588_v35 = vld [vmem:[#allocation8 + $0x10] sm:$0xff]  }
  0x50   :  { %504 = vmatpush3.bf16.msra.mxu0 %v571_v2  ;;  %524 = vmatpush3.bf16.msra.mxu1 %v579_v12  ;;  %v445_v20 = vld [vmem:[%s871_s3] ss:$0 sm:$0xff]  ;;  %v590_v37 = vld [vmem:[#allocation8 + $0x20] sm:$0xff]   ;;  %v591_v38 = vld [vmem:[#allocation8 + $0x28] sm:$0xff]  }
  0x51   :  { %505 = vmatprep.subr.bf16.mxu0 %v722_v0  ;;  %525 = vmatprep.subr.bf16.mxu1 %v722_v0  ;;  %v589_v36 = vld [vmem:[#allocation8 + $0x18] sm:$0xff]   ;;  %v592_v39 = vld [vmem:[#allocation8 + $0x30] sm:$0xff]  }
  0x52   :  { %v593_v40 = vld [vmem:[#allocation8 + $0x38] sm:$0xff]  }
  0x53   :  { %v455_v41 = vld [vmem:[%s871_s3 + $0x1] ss:$0 sm:$0xff]  ;;  %v465_v55 = vld [vmem:[%s873_s5] ss:$0 sm:$0xff]  ;;  %s724_s3 = smov [#allocation10]  }
  0x54   :  { %506 = vmatpush3.bf16.msra.mxu0 %v572_v3  ;;  %526 = vmatpush3.bf16.msra.mxu1 %v580_v13  ;;  %s434_s24 = sshll.u32 %s724_s3, 4  ;;  %s435_s24 = int_to_ptr.vmem [resolvable:$true] %s434_s24 }
  0x55   :  { %507 = vmatprep.subr.bf16.mxu0 %v722_v0  ;;  %527 = vmatprep.subr.bf16.mxu1 %v722_v0  ;;  %s686_s25 = scalar_lea.vmem %s435_s24, 128  ;;  %p691_p5 = scmp.lt.s32.totalorder %s435_s24, %s435_s24 }
  0x56   :  { %p687_p4 = scmp.ne.s32.totalorder %s435_s24, %s686_s25  ;;  %p692_p6 = scmp.lt.s32.totalorder %s686_s25, %s686_s25 }
  0x58   :  { %508 = vmatpush3.bf16.msra.mxu0 %v573_v4  ;;  %528 = vmatpush3.bf16.msra.mxu1 %v581_v14  ;;  %p693_p7 = por %p692_p6, %p691_p5 }
  0x59   :  { %509 = vmatprep.subr.bf16.mxu0 %v722_v0  ;;  %529 = vmatprep.subr.bf16.mxu1 %v722_v0 }
  0x5a   :  { %p694_p8 = pnand %p693_p7, %p687_p4 }
  0x5c   :  { %510 = vmatpush3.bf16.msra.mxu0 %v574_v6  ;;  %530 = vmatpush3.bf16.msra.mxu1 %v582_v15 }
  0x5d   :  { %511 = vmatprep.subr.bf16.mxu0 %v722_v0  ;;  %531 = vmatprep.subr.bf16.mxu1 %v722_v0 }
  0x60   :  { %512 = vmatpush3.bf16.msra.mxu0 %v575_v7  ;;  %532 = vmatpush3.bf16.msra.mxu1 %v583_v16 }
  0x61   :  { %513 = vmatprep.subr.bf16.mxu0 %v722_v0  ;;  %533 = vmatprep.subr.bf16.mxu1 %v722_v0 }
  0x64   :  { %514 = vmatpush3.bf16.msra.mxu0 %v576_v8  ;;  %534 = vmatpush3.bf16.msra.mxu1 %v584_v17 }
  0x65   :  { %515 = vmatprep.subr.bf16.mxu0 %v722_v0  ;;  %535 = vmatprep.subr.bf16.mxu1 %v722_v0 }
  0x68   :  { %516 = vmatpush3.bf16.msra.mxu0 %v577_v9  ;;  %536 = vmatpush3.bf16.msra.mxu1 %v585_v18 }
  0x69   :  { %541 = vmatprep.subr.bf16.mxu0 %v722_v0 }
  0x6b   :  { %518 = vmatmul.mubr.bf16.vlgmr.msra.gmra.mrb[0].mxu0 %v79_v11 }
  0x6c   :  { %557 = vmatprep.mubr.msk.bf16.mxu0 %vm723_vm0, %v722_v0  ;;  %542 = vmatpush3.bf16.msra.mxu0 %v586_v19 }
  0x6d   :  { %543 = vmatprep.subr.bf16.mxu0 %v722_v0 }
  0x70   :  { %544 = vmatpush3.bf16.msra.mxu0 %v587_v34 }
  0x71   :  { %545 = vmatprep.subr.bf16.mxu0 %v722_v0 }
  0x74   :  { %546 = vmatpush3.bf16.msra.mxu0 %v588_v35 }
  0x75   :  { %547 = vmatprep.subr.bf16.mxu0 %v722_v0 }
  0x78   :  { %548 = vmatpush3.bf16.msra.mxu0 %v589_v36 }
  0x79   :  { %549 = vmatprep.subr.bf16.mxu0 %v722_v0 }
  0x7c   :  { %550 = vmatpush3.bf16.msra.mxu0 %v590_v37 }
  0x7d   :  { %551 = vmatprep.subr.bf16.mxu0 %v722_v0 }
  0x80   :  { %552 = vmatpush3.bf16.msra.mxu0 %v591_v38 }
  0x81   :  { %553 = vmatprep.subr.bf16.mxu0 %v722_v0 }
  0x84   :  { %554 = vmatpush3.bf16.msra.mxu0 %v592_v39 }
  0x85   :  { %555 = vmatprep.subr.bf16.mxu0 %v722_v0 }
  0x88   :  { %556 = vmatpush3.bf16.msra.mxu0 %v593_v40 }
 0x13e   :  { %v183_v21 = vpop.f32.mrb[0].mxu0 }
 0x13f   :  { %v184_v22 = vadd.f32 %v445_v20, %v183_v21  ;;  %v519_v23 = vpop.f32.mrb[1].mxu0 }
 0x140   :  { %v186_v24 = vpop.f32.mrb[2].mxu0 }
 0x141   :  { %v189_v25 = vmin.f32 %v184_v22, 0.0  ;;  %v520_v26 = vpop.f32.mrb[3].mxu0  ;;  %vm194_vm1 = vcmp.gt.f32.partialorder %v184_v22, 0.0 }
 0x143   :  { %v190_v27 = vmul.f32 1.442695, %v189_v25 }
 0x145   :  { %594 = vpow2.f32 %v190_v27 }
 0x14f   :  { %v595_v28 = vpop.eup %594 }
 0x150   :  { %v454_v29 = vadd.f32 -1.0, %v595_v28 }
 0x152   :  { %v193_v30 = vmul.f32 1.6732632, %v454_v29 }
 0x154   :  { %v195_v31 = vsel %vm194_vm1, %v184_v22, %v193_v30 }
 0x155   :  { %v196_v32 = vmul.f32 1.050701, %v195_v31 }
 0x157   :  { %v197_v33 = vpack.c.bf16 %v196_v32, %v196_v32 }
 0x159   :  { %538 = vmatmul.mubr.bf16.vlgmr.msra.gmra.mrb[0].mxu1 %v197_v33 }
 0x22c   :  { %v301_v42 = vpop.f32.mrb[0].mxu1 }
 0x22d   :  { %v302_v43 = vadd.f32 %v455_v41, %v301_v42  ;;  %v539_v44 = vpop.f32.mrb[1].mxu1 }
 0x22e   :  { %v304_v45 = vpop.f32.mrb[2].mxu1 }
 0x22f   :  { %v307_v46 = vmin.f32 %v302_v43, 0.0  ;;  %v540_v47 = vpop.f32.mrb[3].mxu1  ;;  %vm312_vm2 = vcmp.gt.f32.partialorder %v302_v43, 0.0 }
 0x231   :  { %v308_v48 = vmul.f32 1.442695, %v307_v46 }
 0x233   :  { %596 = vpow2.f32 %v308_v48 }
 0x23d   :  { %v597_v49 = vpop.eup %596 }
 0x23e   :  { %v464_v50 = vadd.f32 -1.0, %v597_v49 }
 0x240   :  { %v311_v51 = vmul.f32 1.6732632, %v464_v50 }
 0x242   :  { %v313_v52 = vsel %vm312_vm2, %v302_v43, %v311_v51 }
 0x243   :  { %v314_v53 = vmul.f32 1.050701, %v313_v52 }
 0x245   :  { %v315_v54 = vpack.c.bf16 %v314_v53, %v314_v53 }
 0x247   :  { %558 = vmatmul.mubr.bf16.vlgmr.msra.gmra.mrb[4].mxu0 %v315_v54 }
 0x31a   :  { %v421_v56 = vpop.f32.mrb[4].mxu0 }
 0x31b   :  { %v422_v57 = vadd.f32 %v465_v55, %v421_v56  ;;  %v559_v58 = vpop.f32.mrb[5].mxu0 }
 0x31c   :  { %v424_v59 = vpop.f32.mrb[6].mxu0 }
 0x31d   :  { %427 = vst [vmem:[#allocation10] sm:$0xff] %v422_v57  ;;  %v560_v60 = vpop.f32.mrb[7].mxu0 }
 0x31e   :  { %697 = shalt.err (!%p694_p8)
}
 0x31f   :  { %s698_s5 = scalar_lea.hbm %s874_s6, 128 }
 0x320   :  { %p699_p9 = scmp.ne.s32.totalorder %s874_s6, %s698_s5  ;;  %p702_p10 = scmp.lt.u32.totalorder %s698_s5, %s874_s6 }
 0x322   :  { %p704_p11 = pnand %p702_p10, %p699_p9 }
 0x324   :  { %707 = shalt.err (!%p704_p11)
}
 0x325   :  { %437 = dma.vmem_to_hbm [thread:$0]  %s435_s24, 128, %s874_s6, [#allocation4]  }
 0x326   :  { %714 = dma.done.wait [#allocation4], 128  }
 0x327   :  { %715 = vsyncadd [#allocation4], 4294967168 }
 0x328   :  { %441 = vsyncpa [#allocation3], 1 }
 0x329   :  { %442 = vsyncpa [#allocation6], 1 }
 0x32a   :  { %443 = vsyncpa [#allocation9], 1 }
 0x32b   :  { %444 = vsyncpa [#allocation4], 1 }

// kernel: tpu_custom_call.1
= control target key start
LH: loop header
LB: loop body
LE: loop exit
PB: predicated region body
PF: predicated region fallthrough
CT: control target
= control target key end

     0   :  { %11 = vsyncpa [#allocation3], 0  ;;  %s868_s0 = inlined_call_operand.hbm [shape: f32[8,128], index: 0, kind: input, shape index: {}]   ;;  %s869_s1 = inlined_call_operand.hbm [shape: bf16[128,128], index: 1, kind: input, shape index: {}]   ;;  %s870_s2 = inlined_call_operand.hbm [shape: bf16[1,128,128], index: 2, kind: input, shape index: {}]   ;;  %s871_s3 = inlined_call_operand.vmem [shape: f32[2,128], index: 3, kind: input, shape index: {}]   ;;  %s872_s4 = inlined_call_operand.hbm [shape: bf16[128,128], index: 4, kind: input, shape index: {}]   ;;  %s873_s5 = inlined_call_operand.vmem [shape: f32[1,128], index: 5, kind: input, shape index: {}]   ;;  %s874_s6 = inlined_call_operand.hbm [shape: f32[8,128], index: 6, kind: output, shape index: {}]  }
   0x1   :  { %12 = vsyncpa [#allocation6], 0 }
   0x2   :  { %13 = vsyncpa [#allocation9], 0 }
   0x3   :  { %14 = vsyncpa [#allocation4], 0  ;;  %s716_s21 = smov [#allocation5]   ;;  %s598_s25 = scalar_lea.hbm %s869_s1, 1024 }
   0x4   :  { %s30_s22 = sshll.u32 %s716_s21, 4  ;;  %p599_p0 = scmp.ne.s32.totalorder %s869_s1, %s598_s25  ;;  %s31_s22 = int_to_ptr.vmem [resolvable:$true] %s30_s22 }
   0x5   :  { %p602_p1 = scmp.lt.u32.totalorder %s598_s25, %s869_s1 }
   0x7   :  { %p604_p2 = pnand %p602_p1, %p599_p0 }
   0x9   :  { %607 = shalt.err (!%p604_p2)
}
   0xa   :  { %s608_s30 = scalar_lea.vmem %s31_s22, 1024  ;;  %p613_p4 = scmp.lt.s32.totalorder %s31_s22, %s31_s22 }
   0xb   :  { %p609_p3 = scmp.ne.s32.totalorder %s31_s22, %s608_s30  ;;  %p614_p5 = scmp.lt.s32.totalorder %s608_s30, %s608_s30 }
   0xd   :  { %p615_p6 = por %p614_p5, %p613_p4 }
   0xf   :  { %p616_p7 = pnand %p615_p6, %p609_p3 }
  0x11   :  { %619 = shalt.err (!%p616_p7)
}
  0x12   :  { %s717_s7 = smov 64   ;;  %s718_s8 = smov 4  }
  0x13   :  { %36 = dma.hbm_to_vmem [thread:$0]  %s869_s1, 1024, %s31_s22, [#allocation6], %s717_s7, %s717_s7, %s718_s8  }
  0x14   :  { %s719_s11 = smov [#allocation2]   ;;  %s720_s13 = smov [#allocation7]  }
  0x15   :  { %s21_s12 = sshll.u32 %s719_s11, 4  ;;  %s42_s14 = sshll.u32 %s720_s13, 4  ;;  %s22_s12 = int_to_ptr.vmem [resolvable:$true] %s21_s12  ;;  %s43_s14 = int_to_ptr.vmem [resolvable:$true] %s42_s14 }
  0x16   :  { %s620_s17 = scalar_lea.hbm %s868_s0, 128 }
  0x17   :  { %p621_p8 = scmp.ne.s32.totalorder %s868_s0, %s620_s17  ;;  %p624_p9 = scmp.lt.u32.totalorder %s620_s17, %s868_s0 }
  0x19   :  { %p626_p10 = pnand %p624_p9, %p621_p8 }
  0x1b   :  { %629 = shalt.err (!%p626_p10)
}
  0x1c   :  { %s630_s1 = scalar_lea.vmem %s22_s12, 128  ;;  %p635_p12 = scmp.lt.s32.totalorder %s22_s12, %s22_s12 }
  0x1d   :  { %p631_p11 = scmp.ne.s32.totalorder %s22_s12, %s630_s1  ;;  %p636_p13 = scmp.lt.s32.totalorder %s630_s1, %s630_s1 }
  0x1f   :  { %p637_p0 = por %p636_p13, %p635_p12 }
  0x21   :  { %p638_p1 = pnand %p637_p0, %p631_p11 }
  0x23   :  { %641 = shalt.err (!%p638_p1)
}
  0x24   :  { %24 = dma.hbm_to_vmem [thread:$0]  %s868_s0, 128, %s22_s12, [#allocation3]  }
  0x25   :  { %s642_s26 = scalar_lea.hbm %s870_s2, 1024 }
  0x26   :  { %p643_p2 = scmp.ne.s32.totalorder %s870_s2, %s642_s26  ;;  %p646_p3 = scmp.lt.u32.totalorder %s642_s26, %s870_s2 }
  0x28   :  { %p648_p4 = pnand %p646_p3, %p643_p2 }
  0x2a   :  { %651 = shalt.err (!%p648_p4)
}
  0x2b   :  { %s652_s9 = scalar_lea.vmem %s43_s14, 1024  ;;  %p657_p6 = scmp.lt.s32.totalorder %s43_s14, %s43_s14 }
  0x2c   :  { %p653_p5 = scmp.ne.s32.totalorder %s43_s14, %s652_s9  ;;  %p658_p7 = scmp.lt.s32.totalorder %s652_s9, %s652_s9 }
  0x2e   :  { %p659_p8 = por %p658_p7, %p657_p6 }
  0x30   :  { %p660_p9 = pnand %p659_p8, %p653_p5 }
  0x32   :  { %663 = shalt.err (!%p660_p9)
}
  0x33   :  { %48 = dma.hbm_to_vmem [thread:$0]  %s870_s2, 1024, %s43_s14, [#allocation6], %s717_s7, %s717_s7, %s718_s8  }
  0x34   :  { %s721_s11 = smov [#allocation8]   ;;  %s664_s16 = scalar_lea.hbm %s872_s4, 1024 }
  0x35   :  { %s56_s12 = sshll.u32 %s721_s11, 4  ;;  %p665_p10 = scmp.ne.s32.totalorder %s872_s4, %s664_s16  ;;  %s57_s12 = int_to_ptr.vmem [resolvable:$true] %s56_s12 }
  0x36   :  { %p668_p11 = scmp.lt.u32.totalorder %s664_s16, %s872_s4 }
  0x38   :  { %p670_p12 = pnand %p668_p11, %p665_p10 }
  0x3a   :  { %673 = shalt.err (!%p670_p12)
}
  0x3b   :  { %s674_s21 = scalar_lea.vmem %s57_s12, 1024  ;;  %p679_p0 = scmp.lt.s32.totalorder %s57_s12, %s57_s12 }
  0x3c   :  { %p675_p13 = scmp.ne.s32.totalorder %s57_s12, %s674_s21  ;;  %p680_p1 = scmp.lt.s32.totalorder %s674_s21, %s674_s21 }
  0x3e   :  { %p681_p2 = por %p680_p1, %p679_p0 }
  0x40   :  { %p682_p3 = pnand %p681_p2, %p675_p13 }
  0x42   :  { %685 = shalt.err (!%p682_p3)
}
  0x43   :  { %62 = dma.hbm_to_vmem [thread:$0]  %s872_s4, 1024, %s57_s12, [#allocation9], %s717_s7, %s717_s7, %s718_s8  }
  0x44   :  { %708 = dma.done.wait [#allocation3], 128  }
  0x45   :  { %709 = vsyncadd [#allocation3], 4294967168 }
  0x46   :  { %710 = dma.done.wait [#allocation6], 2048  }
  0x47   :  { %711 = vsyncadd [#allocation6], 4294965248 }
  0x48   :  { %712 = dma.done.wait [#allocation9], 1024  }
  0x49   :  { %713 = vsyncadd [#allocation9], 4294966272  ;;  %v722_v0 = vmov 0.0   ;;  %vm723_vm0 = vmmov 0   ;;  %v570_v1 = vld [vmem:[#allocation5] sm:$0xff]   ;;  %v571_v2 = vld [vmem:[#allocation5 + $0x8] sm:$0xff]  }
  0x4a   :  { %501 = vmatprep.subr.bf16.mxu0 %v722_v0  ;;  %517 = vmatprep.mubr.msk.bf16.mxu0 %vm723_vm0, %v722_v0  ;;  %v572_v3 = vld [vmem:[#allocation5 + $0x10] sm:$0xff]   ;;  %v573_v4 = vld [vmem:[#allocation5 + $0x18] sm:$0xff]   ;;  %v578_v5 = vld [vmem:[#allocation7] sm:$0xff]  }
  0x4b   :  { %521 = vmatprep.subr.bf16.mxu1 %v722_v0  ;;  %537 = vmatprep.mubr.msk.bf16.mxu1 %vm723_vm0, %v722_v0  ;;  %v574_v6 = vld [vmem:[#allocation5 + $0x20] sm:$0xff]   ;;  %v575_v7 = vld [vmem:[#allocation5 + $0x28] sm:$0xff]   ;;  %v576_v8 = vld [vmem:[#allocation5 + $0x30] sm:$0xff]  }
  0x4c   :  { %502 = vmatpush3.bf16.msra.mxu0 %v570_v1  ;;  %522 = vmatpush3.bf16.msra.mxu1 %v578_v5  ;;  %v577_v9 = vld [vmem:[#allocation5 + $0x38] sm:$0xff]   ;;  %v579_v12 = vld [vmem:[#allocation7 + $0x8] sm:$0xff]   ;;  %v580_v13 = vld [vmem:[#allocation7 + $0x10] sm:$0xff]  }
  0x4d   :  { %503 = vmatprep.subr.bf16.mxu0 %v722_v0  ;;  %523 = vmatprep.subr.bf16.mxu1 %v722_v0  ;;  %v78_v10 = vld [vmem:[#allocation2] sm:$0xff]  ;;  %v582_v15 = vld [vmem:[#allocation7 + $0x20] sm:$0xff]   ;;  %v583_v16 = vld [vmem:[#allocation7 + $0x28] sm:$0xff]  }
  0x4e   :  { %v79_v11 = vpack.c.bf16 %v78_v10, %v78_v10  ;;  %v581_v14 = vld [vmem:[#allocation7 + $0x18] sm:$0xff]   ;;  %v584_v17 = vld [vmem:[#allocation7 + $0x30] sm:$0xff]   ;;  %v586_v19 = vld [vmem:[#allocation8] sm:$0xff]  }
  0x4f   :  { %v585_v18 = vld [vmem:[#allocation7 + $0x38] sm:$0xff]   ;;  %v587_v34 = vld [vmem:[#allocation8 + $0x8] sm:$0xff]   ;;  %v588_v35 = vld [vmem:[#allocation8 + $0x10] sm:$0xff]  }
  0x50   :  { %504 = vmatpush3.bf16.msra.mxu0 %v571_v2  ;;  %524 = vmatpush3.bf16.msra.mxu1 %v579_v12  ;;  %v445_v20 = vld [vmem:[%s871_s3] ss:$0 sm:$0xff]  ;;  %v590_v37 = vld [vmem:[#allocation8 + $0x20] sm:$0xff]   ;;  %v591_v38 = vld [vmem:[#allocation8 + $0x28] sm:$0xff]  }
  0x51   :  { %505 = vmatprep.subr.bf16.mxu0 %v722_v0  ;;  %525 = vmatprep.subr.bf16.mxu1 %v722_v0  ;;  %v589_v36 = vld [vmem:[#allocation8 + $0x18] sm:$0xff]   ;;  %v592_v39 = vld [vmem:[#allocation8 + $0x30] sm:$0xff]  }
  0x52   :  { %v593_v40 = vld [vmem:[#allocation8 + $0x38] sm:$0xff]  }
  0x53   :  { %v455_v41 = vld [vmem:[%s871_s3 + $0x1] ss:$0 sm:$0xff]  ;;  %v465_v55 = vld [vmem:[%s873_s5] ss:$0 sm:$0xff]  ;;  %s724_s3 = smov [#allocation10]  }
  0x54   :  { %506 = vmatpush3.bf16.msra.mxu0 %v572_v3  ;;  %526 = vmatpush3.bf16.msra.mxu1 %v580_v13  ;;  %s434_s24 = sshll.u32 %s724_s3, 4  ;;  %s435_s24 = int_to_ptr.vmem [resolvable:$true] %s434_s24 }
  0x55   :  { %507 = vmatprep.subr.bf16.mxu0 %v722_v0  ;;  %527 = vmatprep.subr.bf16.mxu1 %v722_v0  ;;  %s686_s25 = scalar_lea.vmem %s435_s24, 128  ;;  %p691_p5 = scmp.lt.s32.totalorder %s435_s24, %s435_s24 }
  0x56   :  { %p687_p4 = scmp.ne.s32.totalorder %s435_s24, %s686_s25  ;;  %p692_p6 = scmp.lt.s32.totalorder %s686_s25, %s686_s25 }
  0x58   :  { %508 = vmatpush3.bf16.msra.mxu0 %v573_v4  ;;  %528 = vmatpush3.bf16.msra.mxu1 %v581_v14  ;;  %p693_p7 = por %p692_p6, %p691_p5 }
  0x59   :  { %509 = vmatprep.subr.bf16.mxu0 %v722_v0  ;;  %529 = vmatprep.subr.bf16.mxu1 %v722_v0 }
  0x5a   :  { %p694_p8 = pnand %p693_p7, %p687_p4 }
  0x5c   :  { %510 = vmatpush3.bf16.msra.mxu0 %v574_v6  ;;  %530 = vmatpush3.bf16.msra.mxu1 %v582_v15 }
  0x5d   :  { %511 = vmatprep.subr.bf16.mxu0 %v722_v0  ;;  %531 = vmatprep.subr.bf16.mxu1 %v722_v0 }
  0x60   :  { %512 = vmatpush3.bf16.msra.mxu0 %v575_v7  ;;  %532 = vmatpush3.bf16.msra.mxu1 %v583_v16 }
  0x61   :  { %513 = vmatprep.subr.bf16.mxu0 %v722_v0  ;;  %533 = vmatprep.subr.bf16.mxu1 %v722_v0 }
  0x64   :  { %514 = vmatpush3.bf16.msra.mxu0 %v576_v8  ;;  %534 = vmatpush3.bf16.msra.mxu1 %v584_v17 }
  0x65   :  { %515 = vmatprep.subr.bf16.mxu0 %v722_v0  ;;  %535 = vmatprep.subr.bf16.mxu1 %v722_v0 }
  0x68   :  { %516 = vmatpush3.bf16.msra.mxu0 %v577_v9  ;;  %536 = vmatpush3.bf16.msra.mxu1 %v585_v18 }
  0x69   :  { %541 = vmatprep.subr.bf16.mxu0 %v722_v0 }
  0x6b   :  { %518 = vmatmul.mubr.bf16.vlgmr.msra.gmra.mrb[0].mxu0 %v79_v11 }
  0x6c   :  { %557 = vmatprep.mubr.msk.bf16.mxu0 %vm723_vm0, %v722_v0  ;;  %542 = vmatpush3.bf16.msra.mxu0 %v586_v19 }
  0x6d   :  { %543 = vmatprep.subr.bf16.mxu0 %v722_v0 }
  0x70   :  { %544 = vmatpush3.bf16.msra.mxu0 %v587_v34 }
  0x71   :  { %545 = vmatprep.subr.bf16.mxu0 %v722_v0 }
  0x74   :  { %546 = vmatpush3.bf16.msra.mxu0 %v588_v35 }
  0x75   :  { %547 = vmatprep.subr.bf16.mxu0 %v722_v0 }
  0x78   :  { %548 = vmatpush3.bf16.msra.mxu0 %v589_v36 }
  0x79   :  { %549 = vmatprep.subr.bf16.mxu0 %v722_v0 }
  0x7c   :  { %550 = vmatpush3.bf16.msra.mxu0 %v590_v37 }
  0x7d   :  { %551 = vmatprep.subr.bf16.mxu0 %v722_v0 }
  0x80   :  { %552 = vmatpush3.bf16.msra.mxu0 %v591_v38 }
  0x81   :  { %553 = vmatprep.subr.bf16.mxu0 %v722_v0 }
  0x84   :  { %554 = vmatpush3.bf16.msra.mxu0 %v592_v39 }
  0x85   :  { %555 = vmatprep.subr.bf16.mxu0 %v722_v0 }
  0x88   :  { %556 = vmatpush3.bf16.msra.mxu0 %v593_v40 }
 0x13e   :  { %v183_v21 = vpop.f32.mrb[0].mxu0 }
 0x13f   :  { %v184_v22 = vadd.f32 %v445_v20, %v183_v21  ;;  %v519_v23 = vpop.f32.mrb[1].mxu0 }
 0x140   :  { %v186_v24 = vpop.f32.mrb[2].mxu0 }
 0x141   :  { %v189_v25 = vmin.f32 %v184_v22, 0.0  ;;  %v520_v26 = vpop.f32.mrb[3].mxu0  ;;  %vm194_vm1 = vcmp.gt.f32.partialorder %v184_v22, 0.0 }
 0x143   :  { %v190_v27 = vmul.f32 1.442695, %v189_v25 }
 0x145   :  { %594 = vpow2.f32 %v190_v27 }
 0x14f   :  { %v595_v28 = vpop.eup %594 }
 0x150   :  { %v454_v29 = vadd.f32 -1.0, %v595_v28 }
 0x152   :  { %v193_v30 = vmul.f32 1.6732632, %v454_v29 }
 0x154   :  { %v195_v31 = vsel %vm194_vm1, %v184_v22, %v193_v30 }
 0x155   :  { %v196_v32 = vmul.f32 1.050701, %v195_v31 }
 0x157   :  { %v197_v33 = vpack.c.bf16 %v196_v32, %v196_v32 }
 0x159   :  { %538 = vmatmul.mubr.bf16.vlgmr.msra.gmra.mrb[0].mxu1 %v197_v33 }
 0x22c   :  { %v301_v42 = vpop.f32.mrb[0].mxu1 }
 0x22d   :  { %v302_v43 = vadd.f32 %v455_v41, %v301_v42  ;;  %v539_v44 = vpop.f32.mrb[1].mxu1 }
 0x22e   :  { %v304_v45 = vpop.f32.mrb[2].mxu1 }
 0x22f   :  { %v307_v46 = vmin.f32 %v302_v43, 0.0  ;;  %v540_v47 = vpop.f32.mrb[3].mxu1  ;;  %vm312_vm2 = vcmp.gt.f32.partialorder %v302_v43, 0.0 }
 0x231   :  { %v308_v48 = vmul.f32 1.442695, %v307_v46 }
 0x233   :  { %596 = vpow2.f32 %v308_v48 }
 0x23d   :  { %v597_v49 = vpop.eup %596 }
 0x23e   :  { %v464_v50 = vadd.f32 -1.0, %v597_v49 }
 0x240   :  { %v311_v51 = vmul.f32 1.6732632, %v464_v50 }
 0x242   :  { %v313_v52 = vsel %vm312_vm2, %v302_v43, %v311_v51 }
 0x243   :  { %v314_v53 = vmul.f32 1.050701, %v313_v52 }
 0x245   :  { %v315_v54 = vpack.c.bf16 %v314_v53, %v314_v53 }
 0x247   :  { %558 = vmatmul.mubr.bf16.vlgmr.msra.gmra.mrb[4].mxu0 %v315_v54 }
 0x31a   :  { %v421_v56 = vpop.f32.mrb[4].mxu0 }
 0x31b   :  { %v422_v57 = vadd.f32 %v465_v55, %v421_v56  ;;  %v559_v58 = vpop.f32.mrb[5].mxu0 }
 0x31c   :  { %v424_v59 = vpop.f32.mrb[6].mxu0 }
 0x31d   :  { %427 = vst [vmem:[#allocation10] sm:$0xff] %v422_v57  ;;  %v560_v60 = vpop.f32.mrb[7].mxu0 }
 0x31e   :  { %697 = shalt.err (!%p694_p8)
}
 0x31f   :  { %s698_s5 = scalar_lea.hbm %s874_s6, 128 }
 0x320   :  { %p699_p9 = scmp.ne.s32.totalorder %s874_s6, %s698_s5  ;;  %p702_p10 = scmp.lt.u32.totalorder %s698_s5, %s874_s6 }
 0x322   :  { %p704_p11 = pnand %p702_p10, %p699_p9 }
 0x324   :  { %707 = shalt.err (!%p704_p11)
}
 0x325   :  { %437 = dma.vmem_to_hbm [thread:$0]  %s435_s24, 128, %s874_s6, [#allocation4]  }
 0x326   :  { %714 = dma.done.wait [#allocation4], 128  }
 0x327   :  { %715 = vsyncadd [#allocation4], 4294967168 }
 0x328   :  { %441 = vsyncpa [#allocation3], 1 }
 0x329   :  { %442 = vsyncpa [#allocation6], 1 }
 0x32a   :  { %443 = vsyncpa [#allocation9], 1 }
 0x32b   :  { %444 = vsyncpa [#allocation4], 1 }

</bundles_post_ra>
